<compile_context>
chip_gen: v7x
topology: tpu7x:2x2x1
jax: 0.10.0
libtpu: 0.0.40
codegen_flags: <defaults>
</compile_context>

<pallas_src>
import math

import jax
import jax.numpy as jnp
from jax.experimental import pallas as pl
from jax.experimental.pallas import tpu as pltpu


LANE = 128          # lane width: pad the output feature dim to this
TB_MAX = 512        # max batch-tile rows (VMEM use is tiny; 512 amortizes per-step cost)


def _round_up(x, m):
    return (x + m - 1) // m * m


def mlp_kernel(x_ref, w1_ref, b1_ref, w2_ref, b2_ref, w3_ref, b3_ref, o_ref):
    # Fused 3-layer MLP on one (TB, in_dim) batch tile.
    # Matmul inputs are bf16 (MXU fast path); accumulation / bias / ReLU in f32.
    x = x_ref[...]                                                    # (TB, in) bf16
    h1 = jnp.dot(x, w1_ref[...], preferred_element_type=jnp.float32) + b1_ref[...]
    h1 = jnp.maximum(h1, 0.0)                                         # ReLU, f32
    h2 = jnp.dot(h1.astype(jnp.bfloat16), w2_ref[...],
                 preferred_element_type=jnp.float32) + b2_ref[...]
    h2 = jnp.maximum(h2, 0.0)                                         # ReLU, f32
    out = jnp.dot(h2.astype(jnp.bfloat16), w3_ref[...],
                  preferred_element_type=jnp.float32) + b3_ref[...]
    o_ref[...] = out.astype(o_ref.dtype)                              # (TB, 128) lane-dense


def sktorch_nn_forward(x, params, tb_max=TB_MAX):
    """x: (B, input_dim) float32.  params: f32 dict with w{1,2,3}:(in,out), b{1,2,3}:(1,out)."""
    B, in_dim = x.shape
    h1_dim = params["w1"].shape[1]
    h2_dim = params["w2"].shape[1]
    out_dim = params["w3"].shape[1]
    out_pad = _round_up(max(out_dim, LANE), LANE)

    # Batch tile: multiple of 16 (bf16 sublane pack), capped at tb_max; pad B up to it.
    TB = min(tb_max, _round_up(B, 16))
    B_pad = _round_up(B, TB)

    xp = x if B_pad == B else jnp.pad(x, ((0, B_pad - B), (0, 0)))
    xp = xp.astype(jnp.bfloat16)

    w1 = params["w1"].astype(jnp.bfloat16)
    w2 = params["w2"].astype(jnp.bfloat16)
    w3 = jnp.pad(params["w3"], ((0, 0), (0, out_pad - out_dim))).astype(jnp.bfloat16)
    b1 = params["b1"].astype(jnp.float32)
    b2 = params["b2"].astype(jnp.float32)
    b3 = jnp.pad(params["b3"], ((0, 0), (0, out_pad - out_dim))).astype(jnp.float32)

    grid = (B_pad // TB,)

    flops = 2 * B_pad * (in_dim * h1_dim + h1_dim * h2_dim + h2_dim * out_pad)
    bytes_accessed = (
        B_pad * in_dim * 2                    # x (bf16)
        + (w1.size + w2.size + w3.size) * 2   # weights (bf16)
        + (b1.size + b2.size + b3.size) * 4   # biases (f32)
        + B_pad * out_pad * 4                 # output (f32)
    )

    out_padded = pl.pallas_call(
        mlp_kernel,
        out_shape=jax.ShapeDtypeStruct((B_pad, out_pad), jnp.float32),
        grid=grid,
        in_specs=[
            pl.BlockSpec((TB, in_dim), lambda i: (i, 0)),       # batch tile of x
            pl.BlockSpec((in_dim, h1_dim), lambda i: (0, 0)),   # weights: VMEM-resident
            pl.BlockSpec((1, h1_dim), lambda i: (0, 0)),
            pl.BlockSpec((h1_dim, h2_dim), lambda i: (0, 0)),
            pl.BlockSpec((1, h2_dim), lambda i: (0, 0)),
            pl.BlockSpec((h2_dim, out_pad), lambda i: (0, 0)),
            pl.BlockSpec((1, out_pad), lambda i: (0, 0)),
        ],
        out_specs=pl.BlockSpec((TB, out_pad), lambda i: (i, 0)),
        compiler_params=pltpu.CompilerParams(
            dimension_semantics=("parallel",),      # megacore split on v7x
            vmem_limit_bytes=32 * 1024 * 1024,      # plenty; safe on v7x's 64 MiB VMEM
        ),
        cost_estimate=pl.CostEstimate(
            flops=flops, transcendentals=0, bytes_accessed=bytes_accessed),
    )(xp, w1, b1, w2, b2, w3, b3)

    return out_padded[:B, :out_dim]


def init_linear(key, fan_in, fan_out):
    """PyTorch-style Linear init U(-1/sqrt(fan_in), 1/sqrt(fan_in)).
    Weight already transposed to (fan_in, fan_out); bias as (1, fan_out)."""
    kw, kb = jax.random.split(key)
    bound = 1.0 / math.sqrt(fan_in)
    w = jax.random.uniform(kw, (fan_in, fan_out), jnp.float32, -bound, bound)
    b = jax.random.uniform(kb, (1, fan_out), jnp.float32, -bound, bound)
    return w, b


def reference_forward_f32(x, p):
    h1 = jnp.maximum(x @ p["w1"] + p["b1"], 0.0)
    h2 = jnp.maximum(h1 @ p["w2"] + p["b2"], 0.0)
    return h2 @ p["w3"] + p["b3"]


def reference_forward_bf16(x, p):
    # Mirrors the kernel numerics (bf16 matmul inputs, f32 accumulation).
    bf = lambda a: a.astype(jnp.bfloat16)
    h1 = jnp.maximum(
        jnp.dot(bf(x), bf(p["w1"]), preferred_element_type=jnp.float32) + p["b1"], 0.0)
    h2 = jnp.maximum(
        jnp.dot(bf(h1), bf(p["w2"]), preferred_element_type=jnp.float32) + p["b2"], 0.0)
    return jnp.dot(bf(h2), bf(p["w3"]), preferred_element_type=jnp.float32) + p["b3"]


if __name__ == "__main__":
    # Shapes consistent with the module: input_dim=16, hidden_layers=[32,32], output_dim=4.
    input_dim, hidden, output_dim = 16, 32, 4

    key = jax.random.PRNGKey(0)
    kx, kx2, k1, k2, k3 = jax.random.split(key, 5)

    w1, b1 = init_linear(k1, input_dim, hidden)
    w2, b2 = init_linear(k2, hidden, hidden)
    w3, b3 = init_linear(k3, hidden, output_dim)
    params = {"w1": w1, "b1": b1, "w2": w2, "b2": b2, "w3": w3, "b3": b3}

    # Small case (batch=8): single grid step, batch padded to the 16-row tile.
    x_small = jax.random.normal(kx, (8, input_dim), jnp.float32)
    out_small = jax.block_until_ready(sktorch_nn_forward(x_small, params))
    assert out_small.shape == (8, output_dim)
    assert jnp.allclose(out_small, reference_forward_bf16(x_small, params),
                        atol=2e-3, rtol=2e-3), "mismatch vs bf16-mirrored reference (small)"
    assert jnp.allclose(out_small, reference_forward_f32(x_small, params),
                        atol=5e-2, rtol=5e-2), "mismatch vs f32 reference (small)"

    # Larger batch exercises the batch grid (grid=(2,), TB=512) and megacore split.
    x_large = jax.random.normal(kx2, (1024, input_dim), jnp.float32)
    out_large = jax.block_until_ready(sktorch_nn_forward(x_large, params))
    assert out_large.shape == (1024, output_dim)
    assert jnp.allclose(out_large, reference_forward_bf16(x_large, params),
                        atol=2e-3, rtol=2e-3), "mismatch vs bf16-mirrored reference (large)"
    assert jnp.allclose(out_large, reference_forward_f32(x_large, params),
                        atol=5e-2, rtol=5e-2), "mismatch vs f32 reference (large)"

    print("KERNEL_OK")
</pallas_src>

<mosaic_0001>
module attributes {stable_mosaic.version = 11 : i64} {
  func.func @mlp_kernel(%arg0: i32, %arg1: memref<16x16xbf16, #tpu.memory_space<vmem>>, %arg2: memref<16x32xbf16, #tpu.memory_space<vmem>>, %arg3: memref<1x32xf32, #tpu.memory_space<vmem>>, %arg4: memref<32x32xbf16, #tpu.memory_space<vmem>>, %arg5: memref<1x32xf32, #tpu.memory_space<vmem>>, %arg6: memref<32x128xbf16, #tpu.memory_space<vmem>>, %arg7: memref<1x128xf32, #tpu.memory_space<vmem>>, %arg8: memref<16x128xf32, #tpu.memory_space<vmem>>) attributes {dimension_semantics = [#tpu.dimension_semantics<parallel>], iteration_bounds = array<i64: 1>, scalar_prefetch = 0 : i64, scratch_operands = 0 : i64, tpu.core_type = #tpu.core_type<tc>, window_params = [{transform_indices = @transform_0, window_bounds = array<i64: 16, 16>}, {pipeline_mode = #tpu.pipeline_mode<synchronous>, transform_indices = @transform_1, window_bounds = array<i64: 16, 32>}, {pipeline_mode = #tpu.pipeline_mode<synchronous>, transform_indices = @transform_2, window_bounds = array<i64: 1, 32>}, {pipeline_mode = #tpu.pipeline_mode<synchronous>, transform_indices = @transform_3, window_bounds = array<i64: 32, 32>}, {pipeline_mode = #tpu.pipeline_mode<synchronous>, transform_indices = @transform_4, window_bounds = array<i64: 1, 32>}, {pipeline_mode = #tpu.pipeline_mode<synchronous>, transform_indices = @transform_5, window_bounds = array<i64: 32, 128>}, {pipeline_mode = #tpu.pipeline_mode<synchronous>, transform_indices = @transform_6, window_bounds = array<i64: 1, 128>}, {transform_indices = @transform_7, window_bounds = array<i64: 16, 128>}]} {
    %c0 = arith.constant 0 : index
    %c0_0 = arith.constant 0 : index
    %0 = vector.load %arg1[%c0, %c0_0] : memref<16x16xbf16, #tpu.memory_space<vmem>>, vector<16x16xbf16>
    %c0_1 = arith.constant 0 : index
    %c0_2 = arith.constant 0 : index
    %1 = vector.load %arg2[%c0_1, %c0_2] : memref<16x32xbf16, #tpu.memory_space<vmem>>, vector<16x32xbf16>
    %cst = arith.constant dense<0.000000e+00> : vector<16x32xf32>
    %2 = tpu.matmul %0, %1, %cst {dimension_numbers = #tpu.dot_dimension_numbers<[1], [0], [0], [1], [0, 0, 1, 1], [], []>} : vector<16x16xbf16>, vector<16x32xbf16>, vector<16x32xf32> -> vector<16x32xf32>
    %c0_3 = arith.constant 0 : index
    %c0_4 = arith.constant 0 : index
    %3 = vector.load %arg3[%c0_3, %c0_4] : memref<1x32xf32, #tpu.memory_space<vmem>>, vector<1x32xf32>
    %4 = vector.broadcast %3 : vector<1x32xf32> to vector<16x32xf32>
    %5 = arith.addf %2, %4 : vector<16x32xf32>
    %cst_5 = arith.constant 0.000000e+00 : f32
    %6 = vector.broadcast %cst_5 : f32 to vector<16x32xf32>
    %7 = arith.maximumf %5, %6 : vector<16x32xf32>
    %8 = arith.truncf %7 : vector<16x32xf32> to vector<16x32xbf16>
    %c0_6 = arith.constant 0 : index
    %c0_7 = arith.constant 0 : index
    %9 = vector.load %arg4[%c0_6, %c0_7] : memref<32x32xbf16, #tpu.memory_space<vmem>>, vector<32x32xbf16>
    %cst_8 = arith.constant dense<0.000000e+00> : vector<16x32xf32>
    %10 = tpu.matmul %8, %9, %cst_8 {dimension_numbers = #tpu.dot_dimension_numbers<[1], [0], [0], [1], [0, 0, 1, 1], [], []>} : vector<16x32xbf16>, vector<32x32xbf16>, vector<16x32xf32> -> vector<16x32xf32>
    %c0_9 = arith.constant 0 : index
    %c0_10 = arith.constant 0 : index
    %11 = vector.load %arg5[%c0_9, %c0_10] : memref<1x32xf32, #tpu.memory_space<vmem>>, vector<1x32xf32>
    %12 = vector.broadcast %11 : vector<1x32xf32> to vector<16x32xf32>
    %13 = arith.addf %10, %12 : vector<16x32xf32>
    %cst_11 = arith.constant 0.000000e+00 : f32
    %14 = vector.broadcast %cst_11 : f32 to vector<16x32xf32>
    %15 = arith.maximumf %13, %14 : vector<16x32xf32>
    %16 = arith.truncf %15 : vector<16x32xf32> to vector<16x32xbf16>
    %c0_12 = arith.constant 0 : index
    %c0_13 = arith.constant 0 : index
    %17 = vector.load %arg6[%c0_12, %c0_13] : memref<32x128xbf16, #tpu.memory_space<vmem>>, vector<32x128xbf16>
    %cst_14 = arith.constant dense<0.000000e+00> : vector<16x128xf32>
    %18 = tpu.matmul %16, %17, %cst_14 {dimension_numbers = #tpu.dot_dimension_numbers<[1], [0], [0], [1], [0, 0, 1, 1], [], []>} : vector<16x32xbf16>, vector<32x128xbf16>, vector<16x128xf32> -> vector<16x128xf32>
    %c0_15 = arith.constant 0 : index
    %c0_16 = arith.constant 0 : index
    %19 = vector.load %arg7[%c0_15, %c0_16] : memref<1x128xf32, #tpu.memory_space<vmem>>, vector<1x128xf32>
    %20 = vector.broadcast %19 : vector<1x128xf32> to vector<16x128xf32>
    %21 = arith.addf %18, %20 : vector<16x128xf32>
    %c0_17 = arith.constant 0 : index
    %c0_18 = arith.constant 0 : index
    %22 = vector.load %arg8[%c0_17, %c0_18] : memref<16x128xf32, #tpu.memory_space<vmem>>, vector<16x128xf32>
    tpu.vector_store %arg8[%c0_17, %c0_18], %21 {strides = array<i32>} : memref<16x128xf32, #tpu.memory_space<vmem>>, vector<16x128xf32>,
    return
  }
  func.func @transform_0(%arg0: i32) -> (i32, i32) {
    %c0_i32 = arith.constant 0 : i32
    %c0_i32_0 = arith.constant 0 : i32
    return %arg0, %c0_i32 : i32, i32
  }
  func.func @transform_1(%arg0: i32) -> (i32, i32) {
    %c0_i32 = arith.constant 0 : i32
    %c0_i32_0 = arith.constant 0 : i32
    %c0_i32_1 = arith.constant 0 : i32
    return %c0_i32, %c0_i32_0 : i32, i32
  }
  func.func @transform_2(%arg0: i32) -> (i32, i32) {
    %c0_i32 = arith.constant 0 : i32
    %c0_i32_0 = arith.constant 0 : i32
    %c0_i32_1 = arith.constant 0 : i32
    return %c0_i32, %c0_i32_0 : i32, i32
  }
  func.func @transform_3(%arg0: i32) -> (i32, i32) {
    %c0_i32 = arith.constant 0 : i32
    %c0_i32_0 = arith.constant 0 : i32
    %c0_i32_1 = arith.constant 0 : i32
    return %c0_i32, %c0_i32_0 : i32, i32
  }
  func.func @transform_4(%arg0: i32) -> (i32, i32) {
    %c0_i32 = arith.constant 0 : i32
    %c0_i32_0 = arith.constant 0 : i32
    %c0_i32_1 = arith.constant 0 : i32
    return %c0_i32, %c0_i32_0 : i32, i32
  }
  func.func @transform_5(%arg0: i32) -> (i32, i32) {
    %c0_i32 = arith.constant 0 : i32
    %c0_i32_0 = arith.constant 0 : i32
    %c0_i32_1 = arith.constant 0 : i32
    return %c0_i32, %c0_i32_0 : i32, i32
  }
  func.func @transform_6(%arg0: i32) -> (i32, i32) {
    %c0_i32 = arith.constant 0 : i32
    %c0_i32_0 = arith.constant 0 : i32
    %c0_i32_1 = arith.constant 0 : i32
    return %c0_i32, %c0_i32_0 : i32, i32
  }
  func.func @transform_7(%arg0: i32) -> (i32, i32) {
    %c0_i32 = arith.constant 0 : i32
    %c0_i32_0 = arith.constant 0 : i32
    return %arg0, %c0_i32 : i32, i32
  }
}

</mosaic_0001>

<bundles_post_ra>
// kernel: tpu_custom_call.1
= control target key start
LH: loop header
LB: loop body
LE: loop exit
PB: predicated region body
PF: predicated region fallthrough
CT: control target
= control target key end

     0   :  { %12 = vsyncpa [#allocation3], 0  ;;  %s580_s0 = inlined_call_operand.hbm [shape: bf16[16,16], index: 0, kind: input, shape index: {}]   ;;  %s581_s1 = inlined_call_operand.hbm [shape: bf16[16,32], index: 1, kind: input, shape index: {}]   ;;  %s582_s2 = inlined_call_operand.vmem [shape: f32[1,32], index: 2, kind: input, shape index: {}]   ;;  %s583_s3 = inlined_call_operand.hbm [shape: bf16[32,32], index: 3, kind: input, shape index: {}]   ;;  %s584_s4 = inlined_call_operand.vmem [shape: f32[1,32], index: 4, kind: input, shape index: {}]   ;;  %s585_s5 = inlined_call_operand.vmem [shape: bf16[32,128], index: 5, kind: input, shape index: {}]   ;;  %s586_s6 = inlined_call_operand.vmem [shape: f32[1,128], index: 6, kind: input, shape index: {}]   ;;  %s587_s7 = inlined_call_operand.hbm [shape: f32[16,128], index: 7, kind: output, shape index: {}]  }
   0x1   :  { %13 = vsyncpa [#allocation6], 0 }
   0x2   :  { %14 = vsyncpa [#allocation4], 0  ;;  %s449_s24 = smov [#allocation5]   ;;  %s450_s26 = smov [#allocation2]  }
   0x3   :  { %s32_s25 = sshll.u32 %s449_s24, 4  ;;  %s20_s27 = sshll.u32 %s450_s26, 4  ;;  %s33_s25 = int_to_ptr.vmem [resolvable:$true] %s32_s25  ;;  %s499_s27 = int_to_ptr.vmem [resolvable:$true] %s20_s27 }
   0x4   :  { %s355_s30 = scalar_lea.hbm %s581_s1, 128 }
   0x5   :  { %p356_p0 = scmp.ne.s32.totalorder %s581_s1, %s355_s30  ;;  %p359_p1 = scmp.lt.u32.totalorder %s355_s30, %s581_s1 }
   0x7   :  { %p361_p2 = pnand %p359_p1, %p356_p0 }
   0x9   :  { %364 = shalt.err (!%p361_p2)
}
   0xa   :  { %s365_s12 = scalar_lea.vmem %s33_s25, 128  ;;  %p370_p4 = scmp.lt.s32.totalorder %s33_s25, %s33_s25 }
   0xb   :  { %p366_p3 = scmp.ne.s32.totalorder %s33_s25, %s365_s12  ;;  %p371_p5 = scmp.lt.s32.totalorder %s365_s12, %s365_s12 }
   0xd   :  { %p372_p6 = por %p371_p5, %p370_p4 }
   0xf   :  { %p373_p7 = pnand %p372_p6, %p366_p3 }
  0x11   :  { %376 = shalt.err (!%p373_p7)
}
  0x12   :  { %s451_s13 = smov 64   ;;  %s452_s14 = smov 4  }
  0x13   :  { %38 = dma.hbm_to_vmem [thread:$0]  %s581_s1, 128, %s33_s25, [#allocation6], %s451_s13, %s451_s13, %s452_s14  }
  0x14   :  { %s377_s19 = scalar_lea.hbm %s580_s0, 128 }
  0x15   :  { %p378_p8 = scmp.ne.s32.totalorder %s580_s0, %s377_s19  ;;  %p381_p9 = scmp.lt.u32.totalorder %s377_s19, %s580_s0 }
  0x17   :  { %p383_p10 = pnand %p381_p9, %p378_p8 }
  0x19   :  { %386 = shalt.err (!%p383_p10)
}
  0x1a   :  { %s387_s24 = scalar_lea.vmem %s499_s27, 128  ;;  %p392_p12 = scmp.lt.s32.totalorder %s499_s27, %s499_s27 }
  0x1b   :  { %p388_p11 = scmp.ne.s32.totalorder %s499_s27, %s387_s24  ;;  %p393_p13 = scmp.lt.s32.totalorder %s387_s24, %s387_s24 }
  0x1d   :  { %p394_p0 = por %p393_p13, %p392_p12 }
  0x1f   :  { %p395_p1 = pnand %p394_p0, %p388_p11 }
  0x21   :  { %398 = shalt.err (!%p395_p1)
}
  0x22   :  { %26 = dma.hbm_to_vmem [thread:$0]  %s580_s0, 128, %s499_s27, [#allocation3], %s451_s13, %s451_s13, %s452_s14  }
  0x23   :  { %s453_s26 = smov [#allocation7]   ;;  %s399_s8 = scalar_lea.hbm %s583_s3, 256 }
  0x24   :  { %s46_s28 = sshll.u32 %s453_s26, 4  ;;  %p400_p2 = scmp.ne.s32.totalorder %s583_s3, %s399_s8  ;;  %s47_s28 = int_to_ptr.vmem [resolvable:$true] %s46_s28 }
  0x25   :  { %p403_p3 = scmp.lt.u32.totalorder %s399_s8, %s583_s3 }
  0x27   :  { %p405_p4 = pnand %p403_p3, %p400_p2 }
  0x29   :  { %408 = shalt.err (!%p405_p4)
}
  0x2a   :  { %s409_s15 = scalar_lea.vmem %s47_s28, 256  ;;  %p414_p6 = scmp.lt.s32.totalorder %s47_s28, %s47_s28 }
  0x2b   :  { %p410_p5 = scmp.ne.s32.totalorder %s47_s28, %s409_s15  ;;  %p415_p7 = scmp.lt.s32.totalorder %s409_s15, %s409_s15 }
  0x2d   :  { %p416_p8 = por %p415_p7, %p414_p6 }
  0x2f   :  { %p417_p9 = pnand %p416_p8, %p410_p5 }
  0x31   :  { %420 = shalt.err (!%p417_p9)
}
  0x32   :  { %52 = dma.hbm_to_vmem [thread:$0]  %s583_s3, 256, %s47_s28, [#allocation6], %s451_s13, %s451_s13, %s452_s14  }
  0x33   :  { %443 = dma.done.wait [#allocation3], 128  }
  0x34   :  { %444 = vsyncadd [#allocation3], 4294967168 }
  0x35   :  { %445 = dma.done.wait [#allocation6], 384  }
  0x36   :  { %446 = vsyncadd [#allocation6], 4294966912  ;;  %v454_v0 = vmov 0.0   ;;  %vm455_vm0 = vmmov 0   ;;  %v349_v1 = vld [vmem:[#allocation5] sm:$0xff]   ;;  %v350_v2 = vld [vmem:[#allocation2] sm:$0xff]  }
  0x37   :  { %317 = vmatprep.subr.bf16.mxu0 %v454_v0  ;;  %319 = vmatprep.mubr.msk.bf16.mxu0 %vm455_vm0, %v454_v0  ;;  %vm91_vm1 = vcmask 130048   ;;  %v351_v3 = vld [vmem:[#allocation7] sm:$0xff]   ;;  %v352_v4 = vld [vmem:[#allocation7 + $0x8] sm:$0xff]   ;;  %vm162_vm2 = vcmask 261120  }
  0x38   :  { %323 = vmatprep.subr.bf16.mxu1 %v454_v0  ;;  %327 = vmatprep.mubr.msk.bf16.mxu1 %vm455_vm0, %v454_v0  ;;  %v297_v5 = vld [vmem:[%s582_s2] ss:$0 sm:$0xff]  ;;  %v354_v16 = vld [vmem:[%s585_s5 + $0x8] sm:$0xff]  }
  0x39   :  { %318 = vmatpush3.bf16.msra.mxu0 %v349_v1  ;;  %324 = vmatpush3.bf16.msra.mxu1 %v351_v3  ;;  %v353_v15 = vld [vmem:[%s585_s5] sm:$0xff]   ;;  %s456_s5 = smov [#allocation8]  }
  0x3a   :  { %331 = vmatprep.subr.bf16.mxu0 %v454_v0  ;;  %325 = vmatprep.subr.bf16.mxu1 %v454_v0  ;;  %v301_v17 = vld [vmem:[%s584_s4] ss:$0 sm:$0xff]  ;;  %s284_s22 = sshll.u32 %s456_s5, 4  ;;  %s285_s22 = int_to_ptr.vmem [resolvable:$true] %s284_s22 }
  0x3b   :  { %v305_v27 = vld [vmem:[%s586_s6] ss:$0 sm:$0xff]  ;;  %s421_s4 = scalar_lea.vmem %s285_s22, 256  ;;  %p426_p11 = scmp.lt.s32.totalorder %s285_s22, %s285_s22 }
  0x3c   :  { %320 = vmatmul.mubr.msk.bf16.vlgmr.msra.gmra.mrb[0].mxu0 %vm91_vm1, %v350_v2  ;;  %p422_p10 = scmp.ne.s32.totalorder %s285_s22, %s421_s4  ;;  %p427_p12 = scmp.lt.s32.totalorder %s421_s4, %s421_s4 }
  0x3d   :  { %335 = vmatprep.mubr.msk.bf16.mxu0 %vm455_vm0, %v454_v0  ;;  %326 = vmatpush3.bf16.msra.mxu1 %v352_v4 }
  0x3e   :  { %332 = vmatpush3.bf16.msra.mxu0 %v353_v15  ;;  %p428_p13 = por %p427_p12, %p426_p11 }
  0x3f   :  { %333 = vmatprep.subr.bf16.mxu0 %v454_v0 }
  0x40   :  { %p429_p0 = pnand %p428_p13, %p422_p10 }
  0x42   :  { %334 = vmatpush3.bf16.msra.mxu0 %v354_v16 }
 0x10f   :  { %v129_v6 = vpop.f32.mrb[0].mxu0 }
 0x110   :  { %v130_v7 = vadd.f32 %v297_v5, %v129_v6  ;;  %v321_v8 = vpop.f32.mrb[1].mxu0 }
 0x111   :  { %v132_v9 = vpop.f32.mrb[2].mxu0 }
 0x112   :  { %v133_v10 = vadd.f32 %v297_v5, %v132_v9  ;;  %v322_v11 = vpop.f32.mrb[3].mxu0  ;;  %v136_v12 = vmax.f32 %v130_v7, 0.0 }
 0x114   :  { %v137_v13 = vmax.f32 %v133_v10, 0.0 }
 0x116   :  { %v138_v14 = vpack.c.bf16 %v137_v13, %v136_v12 }
 0x118   :  { %328 = vmatmul.mubr.msk.bf16.vlgmr.msra.gmra.mrb[0].mxu1 %vm162_vm2, %v138_v14 }
 0x1eb   :  { %v200_v18 = vpop.f32.mrb[0].mxu1 }
 0x1ec   :  { %v201_v19 = vadd.f32 %v301_v17, %v200_v18  ;;  %v329_v20 = vpop.f32.mrb[1].mxu1 }
 0x1ed   :  { %v203_v21 = vpop.f32.mrb[2].mxu1 }
 0x1ee   :  { %v204_v22 = vadd.f32 %v301_v17, %v203_v21  ;;  %v330_v23 = vpop.f32.mrb[3].mxu1  ;;  %v207_v24 = vmax.f32 %v201_v19, 0.0 }
 0x1f0   :  { %v208_v25 = vmax.f32 %v204_v22, 0.0 }
 0x1f2   :  { %v209_v26 = vpack.c.bf16 %v208_v25, %v207_v24 }
 0x1f4   :  { %336 = vmatmul.mubr.msk.bf16.vlgmr.msra.gmra.mrb[4].mxu0 %vm162_vm2, %v209_v26 }
 0x2c7   :  { %v270_v28 = vpop.f32.mrb[4].mxu0 }
 0x2c8   :  { %v271_v29 = vadd.f32 %v305_v27, %v270_v28  ;;  %v337_v30 = vpop.f32.mrb[5].mxu0 }
 0x2c9   :  { %v273_v31 = vpop.f32.mrb[6].mxu0 }
 0x2ca   :  { %277 = vst [vmem:[#allocation8] sm:$0xff] %v271_v29  ;;  %v274_v32 = vadd.f32 %v305_v27, %v273_v31  ;;  %v338_v33 = vpop.f32.mrb[7].mxu0 }
 0x2cc   :  { %278 = vst [vmem:[#allocation8 + $0x8] sm:$0xff] %v274_v32 }
 0x2cd   :  { %432 = shalt.err (!%p429_p0)
}
 0x2ce   :  { %s433_s24 = scalar_lea.hbm %s587_s7, 256 }
 0x2cf   :  { %p434_p1 = scmp.ne.s32.totalorder %s587_s7, %s433_s24  ;;  %p437_p2 = scmp.lt.u32.totalorder %s433_s24, %s587_s7 }
 0x2d1   :  { %p439_p3 = pnand %p437_p2, %p434_p1 }
 0x2d3   :  { %442 = shalt.err (!%p439_p3)
}
 0x2d4   :  { %s457_s29 = smov 128   ;;  %s458_s30 = smov 8  }
 0x2d5   :  { %290 = dma.vmem_to_hbm [thread:$0]  %s285_s22, 256, %s587_s7, [#allocation4], %s457_s29, %s457_s29, %s458_s30  }
 0x2d6   :  { %447 = dma.done.wait [#allocation4], 256  }
 0x2d7   :  { %448 = vsyncadd [#allocation4], 4294967040 }
 0x2d8   :  { %294 = vsyncpa [#allocation3], 1 }
 0x2d9   :  { %295 = vsyncpa [#allocation6], 1 }
 0x2da   :  { %296 = vsyncpa [#allocation4], 1 }

</bundles_post_ra>
